<compile_context>
chip_gen: v7x
topology: tpu7x:2x2x1
jax: 0.10.0
libtpu: 0.0.40
codegen_flags: <defaults>
</compile_context>

<pallas_src>
import functools

import jax
import jax.numpy as jnp
from jax.experimental import pallas as pl
from jax.experimental.pallas import tpu as pltpu


# ----------------------------- tiling policy ------------------------------- #

def _round_up(a: int, b: int) -> int:
    return (a + b - 1) // b * b


def _min_sublane(dtype) -> int:
    # f32 -> 8 rows, bf16 -> 16, int8/fp8 -> 32 (sublane packing).
    return {4: 8, 2: 16, 1: 32}.get(jnp.dtype(dtype).itemsize, 8)


def _choose_tn(out_size: int) -> int:
    # Lane-dense output tiles: multiple of 128, capped at 512.
    return min(512, _round_up(out_size, 128))


def _choose_tk(d_model: int) -> int:
    # Single K step for small/medium d_model (block == full dim is legal),
    # otherwise a 128-aligned divisor, otherwise pad K to 1024.
    if d_model <= 1024:
        return d_model
    for cand in (1024, 512, 256, 128):
        if d_model % cand == 0:
            return cand
    return 1024


# ------------------------------- kernel ------------------------------------ #

def _linear_kernel(x_ref, w_ref, b_ref, o_ref, acc_ref):
    # x_ref: (tm, tk)   w_ref: (tn, tk)   b_ref: (1, tn)
    # o_ref: (tm, tn)   acc_ref: (tm, tn) f32 scratch
    k = pl.program_id(2)

    @pl.when(k == 0)
    def _init():
        acc_ref[...] = jnp.zeros_like(acc_ref)

    # Contract x's last dim with weight's last dim (A @ B^T) -> no wrapper
    # transpose of the weight is ever materialized.
    acc_ref[...] += jax.lax.dot_general(
        x_ref[...],
        w_ref[...],
        dimension_numbers=(((1,), (1,)), ((), ())),
        preferred_element_type=jnp.float32,
    )

    @pl.when(k == pl.num_programs(2) - 1)
    def _finalize():
        o_ref[...] = (acc_ref[...] + b_ref[...]).astype(o_ref.dtype)


# ------------------------------ wrappers ------------------------------------ #

def prepare_generator_params(weight, bias, compute_dtype=None):
    """Pad (and optionally cast) the Linear parameters ONCE, outside the hot path.

    weight : (out_size, d_model)  -- PyTorch Linear layout, kept as-is (no transpose)
    bias   : (out_size,)
    Returns (w_pad, b_pad) with w_pad: (N_pad, K_pad), b_pad: (1, N_pad) float32.
    """
    out_size, d_model = weight.shape
    tn = _choose_tn(out_size)
    tk = _choose_tk(d_model)
    n_pad = _round_up(out_size, tn)
    k_pad = _round_up(d_model, tk)

    w = weight.astype(compute_dtype) if compute_dtype is not None else weight
    w = jnp.pad(w, ((0, n_pad - out_size), (0, k_pad - d_model)))
    # Bias stays f32: the epilogue adds it onto the f32 accumulator.
    b = jnp.pad(bias.astype(jnp.float32), (0, n_pad - out_size)).reshape(1, n_pad)
    return w, b


@functools.partial(jax.jit, static_argnames=("out_size", "compute_dtype", "tm_max"))
def generator_forward(x, w_pad, b_pad, out_size, *, compute_dtype=None, tm_max=256):
    """Pallas equivalent of Generator.forward(x) == nn.Linear(d_model, out_size)(x).

    x      : (..., d_model)
    w_pad  : (N_pad, K_pad)  from prepare_generator_params
    b_pad  : (1, N_pad)      from prepare_generator_params
    returns: (..., out_size)
    """
    orig_dtype = x.dtype
    lead = x.shape[:-1]
    d_model = x.shape[-1]
    n_pad, k_pad = w_pad.shape

    x2d = x.reshape(-1, d_model)
    if compute_dtype is not None:
        x2d = x2d.astype(compute_dtype)
    if k_pad != d_model:
        x2d = jnp.pad(x2d, ((0, 0), (0, k_pad - d_model)))

    M = x2d.shape[0]
    min_rows = _min_sublane(x2d.dtype)
    tm = tm_max if M >= tm_max else _round_up(M, min_rows)
    m_pad = _round_up(M, tm)
    if m_pad != M:
        x2d = jnp.pad(x2d, ((0, m_pad - M), (0, 0)))

    tn = _choose_tn(out_size)
    tk = _choose_tk(d_model)
    assert n_pad % tn == 0 and k_pad % tk == 0, "params not prepared with matching policy"
    gm, gn, gk = m_pad // tm, n_pad // tn, k_pad // tk

    # VMEM budget (double-buffered inputs/outputs + f32 accumulator) w/ headroom,
    # kept comfortably under v7x's 64 MiB physical VMEM.
    xi = jnp.dtype(x2d.dtype).itemsize
    wi = jnp.dtype(w_pad.dtype).itemsize
    oi = jnp.dtype(orig_dtype).itemsize
    vmem_need = (2 * tm * tk * xi + 2 * tn * tk * wi + 2 * tm * tn * oi
                 + 2 * tn * 4 + tm * tn * 4)
    vmem_limit = int(min(max(2 * vmem_need, 32 << 20), 48 << 20))

    cost = pl.CostEstimate(
        flops=2 * m_pad * n_pad * k_pad,
        transcendentals=0,
        bytes_accessed=(m_pad * k_pad * xi + n_pad * k_pad * wi
                        + n_pad * 4 + m_pad * n_pad * oi),
    )

    out2d = pl.pallas_call(
        _linear_kernel,
        out_shape=jax.ShapeDtypeStruct((m_pad, n_pad), orig_dtype),
        grid_spec=pltpu.PrefetchScalarGridSpec(
            num_scalar_prefetch=0,
            grid=(gm, gn, gk),
            in_specs=[
                pl.BlockSpec((tm, tk), lambda i, j, k: (i, k)),   # x rows
                pl.BlockSpec((tn, tk), lambda i, j, k: (j, k)),   # weight (out, in)
                pl.BlockSpec((1, tn), lambda i, j, k: (0, j)),    # bias
            ],
            out_specs=pl.BlockSpec((tm, tn), lambda i, j, k: (i, j)),
            scratch_shapes=[pltpu.VMEM((tm, tn), jnp.float32)],
        ),
        compiler_params=pltpu.CompilerParams(
            dimension_semantics=("parallel", "parallel", "arbitrary"),
            vmem_limit_bytes=vmem_limit,
        ),
        cost_estimate=cost,
    )(x2d, w_pad, b_pad)

    out2d = out2d[:M, :out_size]
    return out2d.reshape(*lead, out_size)


# -------------------------------- test -------------------------------------- #

if __name__ == "__main__":
    # Generator(d_model=32, out_size=16); input shaped (batch, seq, d_model).
    d_model, out_size = 32, 16
    batch, seq = 2, 8

    key = jax.random.PRNGKey(0)
    kx, kw, kb = jax.random.split(key, 3)

    # Deterministic parameter init (PyTorch Linear-style uniform bound).
    bound = 1.0 / (d_model ** 0.5)
    weight = jax.random.uniform(kw, (out_size, d_model), jnp.float32, -bound, bound)
    bias = jax.random.uniform(kb, (out_size,), jnp.float32, -bound, bound)

    x = jax.random.normal(kx, (batch, seq, d_model), jnp.float32)

    # Pad/cast params once (outside the hot path); f32 compute for the tiny demo
    # so the tolerance check is tight (pass compute_dtype=jnp.bfloat16 at scale).
    w_pad, b_pad = prepare_generator_params(weight, bias, compute_dtype=None)

    y = generator_forward(x, w_pad, b_pad, out_size)
    y = jax.block_until_ready(y)

    # Reference check against plain JAX (same math as nn.Linear).
    y_ref = x @ weight.T + bias
    assert y.shape == (batch, seq, out_size)
    assert jnp.allclose(y, y_ref, atol=1e-5, rtol=1e-5), float(jnp.max(jnp.abs(y - y_ref)))

    print("KERNEL_OK")
</pallas_src>

<mosaic_0001>
module attributes {stable_mosaic.version = 11 : i64} {
  func.func @_linear_kernel(%arg0: i32, %arg1: i32, %arg2: i32, %arg3: memref<16x32xf32, #tpu.memory_space<vmem>>, %arg4: memref<128x32xf32, #tpu.memory_space<vmem>>, %arg5: memref<1x128xf32, #tpu.memory_space<vmem>>, %arg6: memref<16x128xf32, #tpu.memory_space<vmem>>, %arg7: memref<16x128xf32, #tpu.memory_space<vmem>>) attributes {dimension_semantics = [#tpu.dimension_semantics<parallel>, #tpu.dimension_semantics<parallel>, #tpu.dimension_semantics<arbitrary>], iteration_bounds = array<i64: 1, 1, 1>, scalar_prefetch = 0 : i64, scratch_operands = 1 : i64, tpu.core_type = #tpu.core_type<tc>, window_params = [{transform_indices = @transform_0, window_bounds = array<i64: 16, 32>}, {transform_indices = @transform_1, window_bounds = array<i64: 128, 32>}, {transform_indices = @transform_2, window_bounds = array<i64: 1, 128>}, {transform_indices = @transform_3, window_bounds = array<i64: 16, 128>}]} {
    %c0_i32 = arith.constant 0 : i32
    %0 = arith.cmpi eq, %arg2, %c0_i32 : i32
    %1 = arith.extui %0 : i1 to i32
    %c0_i32_0 = arith.constant 0 : i32
    %2 = arith.cmpi ne, %1, %c0_i32_0 : i32
    scf.if %2 {
      %cst_10 = arith.constant 0.000000e+00 : f32
      %12 = vector.broadcast %cst_10 : f32 to vector<16x128xf32>
      %c0_11 = arith.constant 0 : index
      %c0_12 = arith.constant 0 : index
      %13 = vector.load %arg7[%c0_11, %c0_12] : memref<16x128xf32, #tpu.memory_space<vmem>>, vector<16x128xf32>
      tpu.vector_store %arg7[%c0_11, %c0_12], %12 {strides = array<i32>} : memref<16x128xf32, #tpu.memory_space<vmem>>, vector<16x128xf32>,
    } else {
    }
    %c0 = arith.constant 0 : index
    %c0_1 = arith.constant 0 : index
    %3 = vector.load %arg7[%c0, %c0_1] : memref<16x128xf32, #tpu.memory_space<vmem>>, vector<16x128xf32>
    %c0_2 = arith.constant 0 : index
    %c0_3 = arith.constant 0 : index
    %4 = vector.load %arg3[%c0_2, %c0_3] : memref<16x32xf32, #tpu.memory_space<vmem>>, vector<16x32xf32>
    %c0_4 = arith.constant 0 : index
    %c0_5 = arith.constant 0 : index
    %5 = vector.load %arg4[%c0_4, %c0_5] : memref<128x32xf32, #tpu.memory_space<vmem>>, vector<128x32xf32>
    %cst = arith.constant dense<0.000000e+00> : vector<16x128xf32>
    %6 = tpu.matmul %4, %5, %cst {dimension_numbers = #tpu.dot_dimension_numbers<[1], [1], [0], [0], [0, 0, 1, 0], [], []>} : vector<16x32xf32>, vector<128x32xf32>, vector<16x128xf32> -> vector<16x128xf32>
    %7 = arith.addf %3, %6 : vector<16x128xf32>
    %c0_6 = arith.constant 0 : index
    %c0_7 = arith.constant 0 : index
    %8 = vector.load %arg7[%c0_6, %c0_7] : memref<16x128xf32, #tpu.memory_space<vmem>>, vector<16x128xf32>
    tpu.vector_store %arg7[%c0_6, %c0_7], %7 {strides = array<i32>} : memref<16x128xf32, #tpu.memory_space<vmem>>, vector<16x128xf32>,
    %c0_i32_8 = arith.constant 0 : i32
    %9 = arith.cmpi eq, %arg2, %c0_i32_8 : i32
    %10 = arith.extui %9 : i1 to i32
    %c0_i32_9 = arith.constant 0 : i32
    %11 = arith.cmpi ne, %10, %c0_i32_9 : i32
    scf.if %11 {
      %c0_10 = arith.constant 0 : index
      %c0_11 = arith.constant 0 : index
      %12 = vector.load %arg7[%c0_10, %c0_11] : memref<16x128xf32, #tpu.memory_space<vmem>>, vector<16x128xf32>
      %c0_12 = arith.constant 0 : index
      %c0_13 = arith.constant 0 : index
      %13 = vector.load %arg5[%c0_12, %c0_13] : memref<1x128xf32, #tpu.memory_space<vmem>>, vector<1x128xf32>
      %14 = vector.broadcast %13 : vector<1x128xf32> to vector<16x128xf32>
      %15 = arith.addf %12, %14 : vector<16x128xf32>
      %c0_14 = arith.constant 0 : index
      %c0_15 = arith.constant 0 : index
      %16 = vector.load %arg6[%c0_14, %c0_15] : memref<16x128xf32, #tpu.memory_space<vmem>>, vector<16x128xf32>
      tpu.vector_store %arg6[%c0_14, %c0_15], %15 {strides = array<i32>} : memref<16x128xf32, #tpu.memory_space<vmem>>, vector<16x128xf32>,
    } else {
    }
    return
  }
  func.func @transform_0(%arg0: i32, %arg1: i32, %arg2: i32) -> (i32, i32) {
    %c0_i32 = arith.constant 0 : i32
    return %arg0, %arg2 : i32, i32
  }
  func.func @transform_1(%arg0: i32, %arg1: i32, %arg2: i32) -> (i32, i32) {
    %c0_i32 = arith.constant 0 : i32
    return %arg1, %arg2 : i32, i32
  }
  func.func @transform_2(%arg0: i32, %arg1: i32, %arg2: i32) -> (i32, i32) {
    %c0_i32 = arith.constant 0 : i32
    %c0_i32_0 = arith.constant 0 : i32
    return %c0_i32, %arg1 : i32, i32
  }
  func.func @transform_3(%arg0: i32, %arg1: i32, %arg2: i32) -> (i32, i32) {
    %c0_i32 = arith.constant 0 : i32
    return %arg0, %arg1 : i32, i32
  }
}

</mosaic_0001>

<bundles_post_ra>
// kernel: generator_forward.1
= control target key start
LH: loop header
LB: loop body
LE: loop exit
PB: predicated region body
PF: predicated region fallthrough
CT: control target
= control target key end

     0   :  { %vm40_vm0 = vcmask 261120   ;;  %s437_s1 = inlined_call_operand.vmem [shape: f32[128,32], index: 1, kind: input, shape index: {}]   ;;  %s438_s0 = inlined_call_operand.vmem [shape: f32[16,32], index: 0, kind: input, shape index: {}]   ;;  %s439_s2 = inlined_call_operand.vmem [shape: f32[1,128], index: 2, kind: input, shape index: {}]   ;;  %s440_s3 = inlined_call_operand.vmem [shape: f32[16,128], index: 3, kind: output, shape index: {}]  }
   0x1   :  { %v24_v0 = vld [vmem:[%s437_s1] sm:$0xff]  ;;  %v25_v1 = vld [vmem:[%s437_s1 + $0x8] sm:$0xff]  ;;  %vm342_vm1 = vmpackc.low %vm40_vm0, %vm40_vm0 }
   0x2   :  { %v266_v3 = vpack.c.bf16 %v25_v1, %v24_v0  ;;  %v26_v4 = vld [vmem:[%s437_s1 + $0x10] sm:$0xff]  ;;  %v27_v5 = vld [vmem:[%s437_s1 + $0x18] sm:$0xff]  ;;  %v22_v7 = vld [vmem:[%s438_s0] sm:$0xff] }
   0x3   :  { %v272_v6 = vpack.c.bf16 %v27_v5, %v26_v4  ;;  %v28_v8 = vld [vmem:[%s437_s1 + $0x20] sm:$0xff]  ;;  %v29_v9 = vld [vmem:[%s437_s1 + $0x28] sm:$0xff]  ;;  %263 = vmatprep.mubr.msk.f32.mxu0 %vm40_vm0, %v22_v7  ;;  %v30_v11 = vld [vmem:[%s437_s1 + $0x30] sm:$0xff] }
   0x4   :  { %268 = vmatprep.subr.msk.bf16.mxu0 %vm342_vm1, %v266_v3  ;;  %v278_v10 = vpack.c.bf16 %v29_v9, %v28_v8  ;;  %v31_v12 = vld [vmem:[%s437_s1 + $0x38] sm:$0xff]  ;;  %v32_v14 = vld [vmem:[%s437_s1 + $0x40] sm:$0xff]  ;;  %v33_v15 = vld [vmem:[%s437_s1 + $0x48] sm:$0xff] }
   0x5   :  { %271 = vmatpush3.bf16.xpose.msk.msra.mxu0 %vm342_vm1, %v266_v3  ;;  %v284_v13 = vpack.c.bf16 %v31_v12, %v30_v11  ;;  %v290_v16 = vpack.c.bf16 %v33_v15, %v32_v14  ;;  %v34_v17 = vld [vmem:[%s437_s1 + $0x50] sm:$0xff]  ;;  %v35_v18 = vld [vmem:[%s437_s1 + $0x58] sm:$0xff]  ;;  %v36_v20 = vld [vmem:[%s437_s1 + $0x60] sm:$0xff] }
   0x6   :  { %274 = vmatprep.subr.msk.bf16.mxu0 %vm342_vm1, %v272_v6  ;;  %v296_v19 = vpack.c.bf16 %v35_v18, %v34_v17  ;;  %v37_v21 = vld [vmem:[%s437_s1 + $0x68] sm:$0xff]  ;;  %v38_v23 = vld [vmem:[%s437_s1 + $0x70] sm:$0xff]  ;;  %v39_v24 = vld [vmem:[%s437_s1 + $0x78] sm:$0xff] }
   0x7   :  { %v302_v22 = vpack.c.bf16 %v37_v21, %v36_v20  ;;  %v308_v25 = vpack.c.bf16 %v39_v24, %v38_v23  ;;  %v23_v26 = vld [vmem:[%s438_s0 + $0x8] sm:$0xff]  ;;  %v212_v27 = vld [vmem:[%s439_s2] ss:$0 sm:$0xff] }
   0xd   :  { %277 = vmatpush3.bf16.xpose.msk.msra.mxu0 %vm342_vm1, %v272_v6 }
   0xe   :  { %280 = vmatprep.subr.msk.bf16.mxu0 %vm342_vm1, %v278_v10 }
  0x15   :  { %283 = vmatpush3.bf16.xpose.msk.msra.mxu0 %vm342_vm1, %v278_v10 }
  0x16   :  { %286 = vmatprep.subr.msk.bf16.mxu0 %vm342_vm1, %v284_v13 }
  0x1d   :  { %289 = vmatpush3.bf16.xpose.msk.msra.mxu0 %vm342_vm1, %v284_v13 }
  0x1e   :  { %292 = vmatprep.subr.msk.bf16.mxu0 %vm342_vm1, %v290_v16 }
  0x25   :  { %295 = vmatpush3.bf16.xpose.msk.msra.mxu0 %vm342_vm1, %v290_v16 }
  0x26   :  { %298 = vmatprep.subr.msk.bf16.mxu0 %vm342_vm1, %v296_v19 }
  0x2d   :  { %301 = vmatpush3.bf16.xpose.msk.msra.mxu0 %vm342_vm1, %v296_v19 }
  0x2e   :  { %304 = vmatprep.subr.msk.bf16.mxu0 %vm342_vm1, %v302_v22 }
  0x35   :  { %307 = vmatpush3.bf16.xpose.msk.msra.mxu0 %vm342_vm1, %v302_v22 }
  0x36   :  { %310 = vmatprep.subr.msk.bf16.mxu0 %vm342_vm1, %v308_v25 }
  0x3d   :  { %313 = vmatpush3.bf16.xpose.msk.msra.mxu0 %vm342_vm1, %v308_v25 }
  0x44   :  { %264 = vmatmul.mubr.msk.f32.vlgmr.msra.gmra.mrb[0].mxu0 %vm40_vm0, %v23_v26 }
 0x117   :  { %v265_v28 = vpop.f32.mrb[0].mxu0 }
 0x118   :  { %v187_v29 = vadd.f32 %v265_v28, %v212_v27  ;;  %v161_v30 = vpop.f32.mrb[1].mxu0 }
 0x119   :  { %v186_v31 = vadd.f32 %v212_v27, %v161_v30 }
 0x11a   :  { %189 = vst [vmem:[%s440_s3 + $0x8] sm:$0xff] %v187_v29 }
 0x11b   :  { %188 = vst [vmem:[%s440_s3] sm:$0xff] %v186_v31 }

</bundles_post_ra>
